<compile_context>
chip_gen: v7x
topology: tpu7x:2x2x1
jax: 0.10.0
libtpu: 0.0.40
codegen_flags: <defaults>
</compile_context>

<pallas_src>
import functools

import jax
import jax.numpy as jnp
from jax.experimental import pallas as pl
from jax.experimental.pallas import tpu as pltpu


LANE = 128                # TPU lane width; matmul minor dims padded to this
VISION_BATCH_TILE = 256   # batch rows per vision grid step (fills MXU M on v6e/v7x)
CLASS_TILE = 128          # class rows per text grid step (lane multiple)
EPS = 1e-6                # L2-normalize epsilon (guards zero rows)


def _round_up(x, m):
    return (x + m - 1) // m * m


def _cdiv(a, b):
    return (a + b - 1) // b


# ---------------------------------------------------------------------------
# Pallas kernels
# ---------------------------------------------------------------------------

def _text_tower_kernel(tok_ref, w_ref, o_ref):
    """Fused text tower tail: proj -> L2-normalize.

    tok_ref : (CLASS_TILE, Dt)  bf16  (token embeds, pre-pooled over ctx_len)
    w_ref   : (Dt, D)           bf16
    o_ref   : (CLASS_TILE, D)   f32   (normalized text embeds)
    """
    f32 = jnp.float32
    txt = jnp.dot(tok_ref[...], w_ref[...], preferred_element_type=f32)
    inv = jax.lax.rsqrt(jnp.sum(txt * txt, axis=-1, keepdims=True) + EPS)
    o_ref[...] = txt * inv


def _vision_logits_kernel(has_prompt, *refs):
    """Fused vision tower tail + CLIP logits for one batch tile.

    pooled_ref : (tile, pd_pad)   bf16  (patch pixels, pre-pooled over patches)
    prompt_ref : (8, Dv)          f32   (prompt patch-mean, only if has_prompt)
    w_patch    : (pd_pad, Dv)     bf16
    w_proj     : (Dv, D)          bf16
    txtT_ref   : (D, C_pad)       bf16  (normalized text embeds, transposed)
    scale_ref  : (1,)             f32   SMEM (exp(logit_scale), pre-exponentiated)
    o_ref      : (tile, C_pad)    f32   (logits_per_image tile)
    """
    if has_prompt:
        (pooled_ref, prompt_ref, w_patch_ref, w_proj_ref,
         txtT_ref, scale_ref, o_ref) = refs
    else:
        (pooled_ref, w_patch_ref, w_proj_ref,
         txtT_ref, scale_ref, o_ref) = refs

    f32 = jnp.float32

    # Patch-embed on the pooled patches (bf16 inputs, f32 MXU accumulation).
    feat = jnp.dot(pooled_ref[...], w_patch_ref[...],
                   preferred_element_type=f32)                  # (tile, Dv)

    if has_prompt:
        # Visual prompt is shared across the batch; mean-pool is linear, so
        # the per-patch prompt add folds exactly into a post-pool add of its
        # (glue-precomputed) patch-mean.
        feat = feat + prompt_ref[0:1, :]                        # broadcast rows

    # Projection to the joint embedding space.
    img = jnp.dot(feat.astype(jnp.bfloat16), w_proj_ref[...],
                  preferred_element_type=f32)                   # (tile, D)

    # L2-normalize with epsilon (guards all-zero padded rows).
    inv = jax.lax.rsqrt(jnp.sum(img * img, axis=-1, keepdims=True) + EPS)
    img_n = (img * inv).astype(jnp.bfloat16)

    # Cosine similarity against the resident pre-transposed text tile
    # (plain MXU matmul, contraction on the natural sublane axis).
    sim = jnp.dot(img_n, txtT_ref[...],
                  preferred_element_type=f32)                   # (tile, C_pad)

    # exp(logit_scale) was hoisted to glue; scalar multiply of the logits tile.
    o_ref[...] = sim * scale_ref[0]
    # logits_per_text (= scale_text_embed @ img_embed.T) is unused in the
    # PyTorch module, so it is not materialized here.


# ---------------------------------------------------------------------------
# Glue (patchify, parameter setup, wrappers around pallas_call)
# ---------------------------------------------------------------------------

def patchify_nchw(image, patch):
    # NCHW -> (B, num_patches, C*patch*patch)
    B, C, H, W = image.shape
    x = image.reshape(B, C, H // patch, patch, W // patch, patch)
    x = x.transpose(0, 2, 4, 1, 3, 5)          # (B, hP, wP, C, p, p)
    return x.reshape(B, (H // patch) * (W // patch), C * patch * patch)


def init_params(key, *, patch, in_ch, vision_width, text_width, embed_dim,
                vocab_size):
    k1, k2, k3, k4 = jax.random.split(key, 4)
    pd = in_ch * patch * patch
    params = {
        "w_patch": jax.random.normal(k1, (pd, vision_width), jnp.float32) * 0.02,
        "w_img_proj": jax.random.normal(k2, (vision_width, embed_dim),
                                        jnp.float32) * 0.02,
        "tok_embed": jax.random.normal(k3, (vocab_size, text_width),
                                       jnp.float32) * 0.02,
        "w_text_proj": jax.random.normal(k4, (text_width, embed_dim),
                                         jnp.float32) * 0.02,
        # CLIP init: logit_scale = ln(1 / 0.07)
        "logit_scale": jnp.array([jnp.log(1.0 / 0.07)], dtype=jnp.float32),
    }
    return params


def make_tokenized_prompt(key, num_classes, ctx_len, vocab_size):
    # Synthetic stand-in for Clip.tokenize("a photo of a {classname}.")
    # TODO(synk): real BPE tokenization of the CUSTOM_TEMPLATES prompts has no
    # Pallas equivalent; deterministic synthetic token ids are used instead.
    return jax.random.randint(key, (num_classes, ctx_len), 0, vocab_size,
                              dtype=jnp.int32)


def precompute_text_embed(params, tokenized_prompt):
    """Text tower, hoisted out of the per-image forward (computed once).

    Returns L2-normalized text embeddings, pre-transposed and pre-cast for the
    vision kernel: (D, C_pad) bf16.  Padded class columns are exactly zero.
    """
    bf16 = jnp.bfloat16
    f32 = jnp.float32
    # Token-embedding gather + ctx_len mean-pool stay in XLA glue (runs once).
    tok = jnp.take(params["tok_embed"], tokenized_prompt, axis=0)  # (C, L, Dt)
    tpool = tok.mean(axis=1)                                       # (C, Dt) f32
    C, Dt = tpool.shape
    D = params["w_text_proj"].shape[1]
    C_pad = _round_up(C, CLASS_TILE)

    tpool_p = jnp.zeros((C_pad, Dt), bf16).at[:C].set(tpool.astype(bf16))
    w_text = params["w_text_proj"].astype(bf16)

    txt_n = pl.pallas_call(
        _text_tower_kernel,
        out_shape=jax.ShapeDtypeStruct((C_pad, D), f32),
        grid=(C_pad // CLASS_TILE,),
        in_specs=[
            pl.BlockSpec((CLASS_TILE, Dt), lambda i: (i, 0)),
            pl.BlockSpec((Dt, D), lambda i: (0, 0)),
        ],
        out_specs=pl.BlockSpec((CLASS_TILE, D), lambda i: (i, 0)),
        compiler_params=pltpu.CompilerParams(
            dimension_semantics=("parallel",)),
    )(tpool_p, w_text)

    # Transpose + bf16 cast hoisted here (once per class set): the vision
    # kernel's resident text tile is half the VMEM, needs no per-step cast,
    # and the similarity matmul contracts the sublane axis (no XLU transpose).
    return txt_n.T.astype(bf16)


def custom_clip_forward(params, image, text_embed_T, exp_scale, num_classes,
                        prompt_token=None, *, patch=4):
    """Mirrors CustomCLIP.forward: returns logits_per_image (B, num_classes).

    `text_embed_T` is the hoisted, normalized, transposed (D, C_pad) bf16 text
    tower output; `exp_scale` is the pre-exponentiated logit scale, shape (1,).
    """
    bf16 = jnp.bfloat16
    f32 = jnp.float32
    B = image.shape[0]
    Dv = params["w_patch"].shape[1]
    D = params["w_img_proj"].shape[1]
    C_pad = text_embed_T.shape[1]

    # Pre-pool patches over the patch axis in glue: cuts the kernel's dominant
    # HBM input stream and the patch-embed MACs by nP-x and removes the
    # block-diagonal mean-pool matmul from the kernel entirely.
    # TODO(synk): exact only because this synthetic vision tower is linear up
    # to pooling; a real CLIP ViT (transformer blocks) would not permit it.
    pooled = patchify_nchw(image, patch).mean(axis=1)            # (B, pd) f32
    pd = pooled.shape[1]
    pd_pad = _round_up(pd, LANE)                                 # K -> 128 mult.

    # >= 2 batch tiles so dimension_semantics=("parallel",) can shard the grid
    # across v7x's two TensorCores; padded rows are zero and sliced off.
    n_tiles = max(_cdiv(B, VISION_BATCH_TILE), 2)
    B_pad = n_tiles * VISION_BATCH_TILE

    pooled_p = jnp.zeros((B_pad, pd_pad), bf16)
    pooled_p = pooled_p.at[:B, :pd].set(pooled.astype(bf16))
    w_patch_p = jnp.zeros((pd_pad, Dv), bf16)
    w_patch_p = w_patch_p.at[:pd].set(params["w_patch"].astype(bf16))
    w_proj = params["w_img_proj"].astype(bf16)

    has_prompt = prompt_token is not None
    inputs = [pooled_p]
    in_specs = [pl.BlockSpec((VISION_BATCH_TILE, pd_pad), lambda i: (i, 0))]
    if has_prompt:
        # Shared across the batch (torch does .repeat(bs,1,1)); its patch-mean
        # is precomputed here (hoisted XLU reduce), sublane-padded to 8 rows.
        prompt_mean = prompt_token.reshape(-1, Dv).mean(
            axis=0, keepdims=True).astype(f32)                   # (1, Dv)
        prompt_pad = jnp.broadcast_to(prompt_mean, (8, Dv))      # (8, Dv)
        inputs.append(prompt_pad)
        in_specs.append(pl.BlockSpec((8, Dv), lambda i: (0, 0)))
    inputs += [w_patch_p, w_proj, text_embed_T, exp_scale]
    in_specs += [
        pl.BlockSpec((pd_pad, Dv), lambda i: (0, 0)),
        pl.BlockSpec((Dv, D), lambda i: (0, 0)),
        pl.BlockSpec((D, C_pad), lambda i: (0, 0)),
        pl.BlockSpec(memory_space=pltpu.MemorySpace.SMEM),
    ]

    kernel = functools.partial(_vision_logits_kernel, has_prompt)
    logits_pad = pl.pallas_call(
        kernel,
        out_shape=jax.ShapeDtypeStruct((B_pad, C_pad), f32),
        grid=(n_tiles,),
        in_specs=in_specs,
        out_specs=pl.BlockSpec((VISION_BATCH_TILE, C_pad), lambda i: (i, 0)),
        compiler_params=pltpu.CompilerParams(
            dimension_semantics=("parallel",),
            vmem_limit_bytes=32 * 1024 * 1024),
    )(*inputs)

    return logits_pad[:B, :num_classes]


# ---------------------------------------------------------------------------
# Reference (pure jnp, mirrors the kernel's pre-pool + bf16/f32 order)
# ---------------------------------------------------------------------------

def reference_forward(params, image, tokenized_prompt, prompt_token=None,
                      *, patch=4):
    bf16 = jnp.bfloat16
    f32 = jnp.float32
    Dv = params["w_patch"].shape[1]
    # vision
    pooled = patchify_nchw(image, patch).mean(axis=1).astype(bf16)   # (B, pd)
    feat = jnp.dot(pooled, params["w_patch"].astype(bf16),
                   preferred_element_type=f32)                       # (B, Dv)
    if prompt_token is not None:
        feat = feat + prompt_token.reshape(-1, Dv).mean(
            axis=0, keepdims=True).astype(f32)
    img = jnp.dot(feat.astype(bf16), params["w_img_proj"].astype(bf16),
                  preferred_element_type=f32)                        # (B, D)
    img_n = img * jax.lax.rsqrt(jnp.sum(img * img, -1, keepdims=True) + EPS)
    # text
    tok = jnp.take(params["tok_embed"], tokenized_prompt, axis=0)    # (C, L, Dt)
    tpool = tok.mean(axis=1).astype(bf16)                            # (C, Dt)
    txt = jnp.dot(tpool, params["w_text_proj"].astype(bf16),
                  preferred_element_type=f32)                        # (C, D)
    txt_n = txt * jax.lax.rsqrt(jnp.sum(txt * txt, -1, keepdims=True) + EPS)
    # logits
    sim = jnp.dot(img_n.astype(bf16), txt_n.T.astype(bf16),
                  preferred_element_type=f32)
    return sim * jnp.exp(params["logit_scale"][0])


# ---------------------------------------------------------------------------

if __name__ == "__main__":
    B, C_in, H, W = 2, 3, 16, 16
    PATCH = 4
    VISION_WIDTH = 128   # lane-aligned model dims (128-multiples)
    TEXT_WIDTH = 128
    EMBED_DIM = 128
    VOCAB = 100
    NUM_CLASSES = 5
    CTX_LEN = 8

    root = jax.random.PRNGKey(0)
    k_img, k_param, k_tok, k_prompt = jax.random.split(root, 4)

    image = jax.random.normal(k_img, (B, C_in, H, W), jnp.float32)
    params = init_params(k_param, patch=PATCH, in_ch=C_in,
                         vision_width=VISION_WIDTH, text_width=TEXT_WIDTH,
                         embed_dim=EMBED_DIM, vocab_size=VOCAB)
    tokenized = make_tokenized_prompt(k_tok, NUM_CLASSES, CTX_LEN, VOCAB)

    # Text tower hoisted: computed once per class set, reused for every batch.
    text_embed_T = precompute_text_embed(params, tokenized)
    # exp(logit_scale) hoisted out of the per-step kernel body.
    exp_scale = jnp.exp(params["logit_scale"])

    # ---- path 1: prompt_token=None (default forward) ----
    logits = custom_clip_forward(params, image, text_embed_T, exp_scale,
                                 NUM_CLASSES, prompt_token=None, patch=PATCH)
    logits = jax.block_until_ready(logits)
    ref = reference_forward(params, image, tokenized, None, patch=PATCH)

    assert logits.shape == (B, NUM_CLASSES), logits.shape
    assert bool(jnp.all(jnp.isfinite(logits)))
    assert jnp.allclose(logits, ref, atol=2e-2, rtol=2e-2), (logits, ref)

    # ---- path 2: with a visual prompt_token (1, nP, Dv) ----
    nP = (H // PATCH) * (W // PATCH)
    prompt = 0.1 * jax.random.normal(k_prompt, (1, nP, VISION_WIDTH),
                                     jnp.float32)
    logits_p = custom_clip_forward(params, image, text_embed_T, exp_scale,
                                   NUM_CLASSES, prompt_token=prompt,
                                   patch=PATCH)
    logits_p = jax.block_until_ready(logits_p)
    ref_p = reference_forward(params, image, tokenized, prompt, patch=PATCH)

    assert logits_p.shape == (B, NUM_CLASSES), logits_p.shape
    assert bool(jnp.all(jnp.isfinite(logits_p)))
    assert jnp.allclose(logits_p, ref_p, atol=2e-2, rtol=2e-2), (logits_p, ref_p)

    print("KERNEL_OK")
</pallas_src>

<mosaic_0001>
module attributes {stable_mosaic.version = 11 : i64} {
  func.func @_text_tower_kernel(%arg0: i32, %arg1: memref<128x128xbf16, #tpu.memory_space<vmem>>, %arg2: memref<128x128xbf16, #tpu.memory_space<vmem>>, %arg3: memref<128x128xf32, #tpu.memory_space<vmem>>) attributes {dimension_semantics = [#tpu.dimension_semantics<parallel>], iteration_bounds = array<i64: 1>, scalar_prefetch = 0 : i64, scratch_operands = 0 : i64, tpu.core_type = #tpu.core_type<tc>, window_params = [{transform_indices = @transform_0, window_bounds = array<i64: 128, 128>}, {pipeline_mode = #tpu.pipeline_mode<synchronous>, transform_indices = @transform_1, window_bounds = array<i64: 128, 128>}, {transform_indices = @transform_2, window_bounds = array<i64: 128, 128>}]} {
    %c0 = arith.constant 0 : index
    %c0_0 = arith.constant 0 : index
    %0 = vector.load %arg1[%c0, %c0_0] : memref<128x128xbf16, #tpu.memory_space<vmem>>, vector<128x128xbf16>
    %c0_1 = arith.constant 0 : index
    %c0_2 = arith.constant 0 : index
    %1 = vector.load %arg2[%c0_1, %c0_2] : memref<128x128xbf16, #tpu.memory_space<vmem>>, vector<128x128xbf16>
    %cst = arith.constant dense<0.000000e+00> : vector<128x128xf32>
    %2 = tpu.matmul %0, %1, %cst {dimension_numbers = #tpu.dot_dimension_numbers<[1], [0], [0], [1], [0, 0, 1, 1], [], []>} : vector<128x128xbf16>, vector<128x128xbf16>, vector<128x128xf32> -> vector<128x128xf32>
    %3 = arith.mulf %2, %2 : vector<128x128xf32>
    %cst_3 = arith.constant dense<0.000000e+00> : vector<128xf32>
    %4 = vector.multi_reduction <add>, %3, %cst_3 [1] : vector<128x128xf32> to vector<128xf32>
    %5 = vector.shape_cast %4 : vector<128xf32> to vector<128x1xf32>
    %cst_4 = arith.constant 9.99999997E-7 : f32
    %6 = vector.broadcast %cst_4 : f32 to vector<128x1xf32>
    %7 = arith.addf %5, %6 : vector<128x1xf32>
    %8 = math.rsqrt %7 : vector<128x1xf32>
    %9 = vector.broadcast %8 : vector<128x1xf32> to vector<128x128xf32>
    %10 = arith.mulf %2, %9 : vector<128x128xf32>
    %c0_5 = arith.constant 0 : index
    %c0_6 = arith.constant 0 : index
    %11 = vector.load %arg3[%c0_5, %c0_6] : memref<128x128xf32, #tpu.memory_space<vmem>>, vector<128x128xf32>
    tpu.vector_store %arg3[%c0_5, %c0_6], %10 {strides = array<i32>} : memref<128x128xf32, #tpu.memory_space<vmem>>, vector<128x128xf32>,
    return
  }
  func.func @transform_0(%arg0: i32) -> (i32, i32) {
    %c0_i32 = arith.constant 0 : i32
    %c0_i32_0 = arith.constant 0 : i32
    return %arg0, %c0_i32 : i32, i32
  }
  func.func @transform_1(%arg0: i32) -> (i32, i32) {
    %c0_i32 = arith.constant 0 : i32
    %c0_i32_0 = arith.constant 0 : i32
    %c0_i32_1 = arith.constant 0 : i32
    return %c0_i32, %c0_i32_0 : i32, i32
  }
  func.func @transform_2(%arg0: i32) -> (i32, i32) {
    %c0_i32 = arith.constant 0 : i32
    %c0_i32_0 = arith.constant 0 : i32
    return %arg0, %c0_i32 : i32, i32
  }
}

</mosaic_0001>

<bundles_post_ra>
// kernel: tpu_custom_call.1
= control target key start
LH: loop header
LB: loop body
LE: loop exit
PB: predicated region body
PF: predicated region fallthrough
CT: control target
= control target key end

     0   :  { %7 = vsyncpa [#allocation3], 0  ;;  %s741_s0 = inlined_call_operand.hbm [shape: bf16[128,128], index: 0, kind: input, shape index: {}]   ;;  %s742_s1 = inlined_call_operand.hbm [shape: bf16[128,128], index: 1, kind: input, shape index: {}]   ;;  %s743_s2 = inlined_call_operand.hbm [shape: f32[128,128], index: 2, kind: output, shape index: {}]  }
   0x1   :  { %8 = vsyncpa [#allocation6], 0 }
   0x2   :  { %9 = vsyncpa [#allocation4], 0  ;;  %s603_s9 = smov [#allocation2]   ;;  %s531_s13 = scalar_lea.hbm %s741_s0, 1024 }
   0x3   :  { %s15_s10 = sshll.u32 %s603_s9, 4  ;;  %p532_p0 = scmp.ne.s32.totalorder %s741_s0, %s531_s13  ;;  %s16_s10 = int_to_ptr.vmem [resolvable:$true] %s15_s10 }
   0x4   :  { %p535_p1 = scmp.lt.u32.totalorder %s531_s13, %s741_s0 }
   0x6   :  { %p537_p2 = pnand %p535_p1, %p532_p0 }
   0x8   :  { %540 = shalt.err (!%p537_p2)
}
   0x9   :  { %s541_s18 = scalar_lea.vmem %s16_s10, 1024  ;;  %p546_p4 = scmp.lt.s32.totalorder %s16_s10, %s16_s10 }
   0xa   :  { %p542_p3 = scmp.ne.s32.totalorder %s16_s10, %s541_s18  ;;  %p547_p5 = scmp.lt.s32.totalorder %s541_s18, %s541_s18 }
   0xc   :  { %p548_p6 = por %p547_p5, %p546_p4 }
   0xe   :  { %p549_p7 = pnand %p548_p6, %p542_p3 }
  0x10   :  { %552 = shalt.err (!%p549_p7)
}
  0x11   :  { %s604_s19 = smov 64   ;;  %s605_s20 = smov 4  }
  0x12   :  { %21 = dma.hbm_to_vmem [thread:$0]  %s741_s0, 1024, %s16_s10, [#allocation3], %s604_s19, %s604_s19, %s605_s20  }
  0x13   :  { %s606_s23 = smov [#allocation5]   ;;  %s553_s27 = scalar_lea.hbm %s742_s1, 1024 }
  0x14   :  { %s27_s24 = sshll.u32 %s606_s23, 4  ;;  %p554_p8 = scmp.ne.s32.totalorder %s742_s1, %s553_s27  ;;  %s28_s24 = int_to_ptr.vmem [resolvable:$true] %s27_s24 }
  0x15   :  { %p557_p9 = scmp.lt.u32.totalorder %s553_s27, %s742_s1 }
  0x17   :  { %p559_p10 = pnand %p557_p9, %p554_p8 }
  0x19   :  { %562 = shalt.err (!%p559_p10)
}
  0x1a   :  { %s563_s4 = scalar_lea.vmem %s28_s24, 1024  ;;  %p568_p12 = scmp.lt.s32.totalorder %s28_s24, %s28_s24 }
  0x1b   :  { %p564_p11 = scmp.ne.s32.totalorder %s28_s24, %s563_s4  ;;  %p569_p13 = scmp.lt.s32.totalorder %s563_s4, %s563_s4 }
  0x1d   :  { %p570_p0 = por %p569_p13, %p568_p12 }
  0x1f   :  { %p571_p1 = pnand %p570_p0, %p564_p11 }
  0x21   :  { %574 = shalt.err (!%p571_p1)
}
  0x22   :  { %33 = dma.hbm_to_vmem [thread:$0]  %s742_s1, 1024, %s28_s24, [#allocation6], %s604_s19, %s604_s19, %s605_s20  }
  0x23   :  { %597 = dma.done.wait [#allocation3], 1024  }
  0x24   :  { %598 = vsyncadd [#allocation3], 4294966272 }
  0x25   :  { %599 = dma.done.wait [#allocation6], 1024  }
  0x26   :  { %600 = vsyncadd [#allocation6], 4294966272  ;;  %v483_v0 = vld [vmem:[#allocation5] sm:$0xff]   ;;  %v484_v1 = vld [vmem:[#allocation5 + $0x8] sm:$0xff]   ;;  %s607_s1 = smov [#allocation7]  }
  0x27   :  { %428 = vmatprep.subr.bf16.mxu0 %v483_v0  ;;  %460 = vmatprep.subr.bf16.mxu1 %v483_v0  ;;  %v485_v2 = vld [vmem:[#allocation5 + $0x10] sm:$0xff]   ;;  %v486_v3 = vld [vmem:[#allocation5 + $0x18] sm:$0xff]   ;;  %v491_v4 = vld [vmem:[#allocation2] sm:$0xff]   ;;  %s383_s6 = sshll.u32 %s607_s1, 4  ;;  %s384_s6 = int_to_ptr.vmem [resolvable:$true] %s383_s6 }
  0x28   :  { %429 = vmatpush3.bf16.msra.mxu0 %v483_v0  ;;  %468 = vmatpush3.bf16.msra.mxu1 %v483_v0  ;;  %v492_v5 = vld [vmem:[#allocation2 + $0x20] sm:$0xff]   ;;  %v488_v7 = vld [vmem:[#allocation5 + $0x28] sm:$0xff]   ;;  %v489_v8 = vld [vmem:[#allocation5 + $0x30] sm:$0xff]   ;;  %s575_s7 = scalar_lea.vmem %s384_s6, 2048  ;;  %p580_p3 = scmp.lt.s32.totalorder %s384_s6, %s384_s6 }
  0x29   :  { %430 = vmatprep.subr.bf16.mxu0 %v484_v1  ;;  %461 = vmatprep.subr.bf16.mxu1 %v484_v1  ;;  %v487_v6 = vld [vmem:[#allocation5 + $0x20] sm:$0xff]   ;;  %v490_v9 = vld [vmem:[#allocation5 + $0x38] sm:$0xff]   ;;  %v493_v10 = vld [vmem:[#allocation2 + $0x8] sm:$0xff]   ;;  %p576_p2 = scmp.ne.s32.totalorder %s384_s6, %s575_s7  ;;  %p581_p4 = scmp.lt.s32.totalorder %s575_s7, %s575_s7 }
  0x2a   :  { %444 = vmatprep.mubr.bf16.mxu0 %v491_v4  ;;  %452 = vmatprep.mubr.bf16.mxu1 %v492_v5  ;;  %v494_v11 = vld [vmem:[#allocation2 + $0x28] sm:$0xff]   ;;  %v495_v12 = vld [vmem:[#allocation2 + $0x10] sm:$0xff]   ;;  %v496_v14 = vld [vmem:[#allocation2 + $0x18] sm:$0xff]  }
  0x2b   :  { %v497_v13 = vld [vmem:[#allocation2 + $0x30] sm:$0xff]   ;;  %v498_v15 = vld [vmem:[#allocation2 + $0x38] sm:$0xff]   ;;  %p582_p5 = por %p581_p4, %p580_p3 }
  0x2c   :  { %431 = vmatpush3.bf16.msra.mxu0 %v484_v1  ;;  %469 = vmatpush3.bf16.msra.mxu1 %v484_v1 }
  0x2d   :  { %432 = vmatprep.subr.bf16.mxu0 %v485_v2  ;;  %462 = vmatprep.subr.bf16.mxu1 %v485_v2  ;;  %p583_p6 = pnand %p582_p5, %p576_p2 }
  0x30   :  { %433 = vmatpush3.bf16.msra.mxu0 %v485_v2  ;;  %470 = vmatpush3.bf16.msra.mxu1 %v485_v2 }
  0x31   :  { %434 = vmatprep.subr.bf16.mxu0 %v486_v3  ;;  %463 = vmatprep.subr.bf16.mxu1 %v486_v3 }
  0x34   :  { %435 = vmatpush3.bf16.msra.mxu0 %v486_v3  ;;  %471 = vmatpush3.bf16.msra.mxu1 %v486_v3 }
  0x35   :  { %436 = vmatprep.subr.bf16.mxu0 %v487_v6  ;;  %464 = vmatprep.subr.bf16.mxu1 %v487_v6 }
  0x38   :  { %437 = vmatpush3.bf16.msra.mxu0 %v487_v6  ;;  %472 = vmatpush3.bf16.msra.mxu1 %v487_v6 }
  0x39   :  { %438 = vmatprep.subr.bf16.mxu0 %v488_v7  ;;  %465 = vmatprep.subr.bf16.mxu1 %v488_v7 }
  0x3c   :  { %439 = vmatpush3.bf16.msra.mxu0 %v488_v7  ;;  %473 = vmatpush3.bf16.msra.mxu1 %v488_v7 }
  0x3d   :  { %440 = vmatprep.subr.bf16.mxu0 %v489_v8  ;;  %466 = vmatprep.subr.bf16.mxu1 %v489_v8 }
  0x40   :  { %441 = vmatpush3.bf16.msra.mxu0 %v489_v8  ;;  %474 = vmatpush3.bf16.msra.mxu1 %v489_v8 }
  0x41   :  { %442 = vmatprep.subr.bf16.mxu0 %v490_v9  ;;  %467 = vmatprep.subr.bf16.mxu1 %v490_v9 }
  0x44   :  { %443 = vmatpush3.bf16.msra.mxu0 %v490_v9  ;;  %475 = vmatpush3.bf16.msra.mxu1 %v490_v9 }
  0x47   :  { %445 = vmatmul.mubr.bf16.vlgmr.msra.gmra.mrb[0].mxu0 %v493_v10  ;;  %453 = vmatmul.mubr.bf16.vlgmr.msra.gmra.mrb[0].mxu1 %v494_v11 }
  0x48   :  { %448 = vmatprep.mubr.bf16.mxu0 %v495_v12  ;;  %456 = vmatprep.mubr.bf16.mxu1 %v497_v13 }
  0x4f   :  { %449 = vmatmul.mubr.bf16.gmra.mrb[4].mxu0 %v496_v14  ;;  %457 = vmatmul.mubr.bf16.gmra.mrb[4].mxu1 %v498_v15 }
 0x11a   :  { %v649_v16 = vpop.f32.mrb[0].mxu0  ;;  %v651_v17 = vpop.f32.mrb[0].mxu1 }
 0x11b   :  { %v653_v18 = vpop.f32.mrb[1].mxu0  ;;  %v655_v19 = vpop.f32.mrb[1].mxu1  ;;  %v276_v20 = vmul.f32 %v651_v17, %v651_v17  ;;  %v268_v21 = vmul.f32 %v649_v16, %v649_v16 }
 0x11c   :  { %v661_v22 = vpop.f32.mrb[2].mxu0  ;;  %v663_v23 = vpop.f32.mrb[2].mxu1  ;;  %v266_v26 = vmul.f32 %v653_v18, %v653_v18  ;;  %v274_v30 = vmul.f32 %v655_v19, %v655_v19 }
 0x11d   :  { %302 = vadd.xlane.f32.xlu0 %v276_v20  ;;  %v665_v24 = vpop.f32.mrb[3].mxu1  ;;  %286 = vadd.xlane.f32.xlu1 %v268_v21  ;;  %v667_v25 = vpop.f32.mrb[3].mxu0  ;;  %v269_v27 = vmul.f32 %v661_v22, %v661_v22  ;;  %v277_v31 = vmul.f32 %v663_v23, %v663_v23 }
 0x11e   :  { %v275_v38 = vmul.f32 %v665_v24, %v665_v24  ;;  %v267_v39 = vmul.f32 %v667_v25, %v667_v25 }
 0x121   :  { %282 = vadd.xlane.f32.xlu0 %v266_v26  ;;  %288 = vadd.xlane.f32.xlu1 %v269_v27 }
 0x122   :  { %v673_v28 = vpop.f32.mrb[4].mxu0  ;;  %v675_v29 = vpop.f32.mrb[4].mxu1 }
 0x123   :  { %v681_v32 = vpop.f32.mrb[5].mxu0  ;;  %v683_v33 = vpop.f32.mrb[5].mxu1  ;;  %v272_v40 = vmul.f32 %v673_v28, %v673_v28  ;;  %v280_v46 = vmul.f32 %v675_v29, %v675_v29 }
 0x124   :  { %v685_v34 = vpop.f32.mrb[6].mxu0  ;;  %v687_v35 = vpop.f32.mrb[6].mxu1  ;;  %v270_v43 = vmul.f32 %v681_v32, %v681_v32  ;;  %v278_v45 = vmul.f32 %v683_v33, %v683_v33 }
 0x125   :  { %298 = vadd.xlane.f32.xlu0 %v274_v30  ;;  %304 = vadd.xlane.f32.xlu1 %v277_v31  ;;  %v689_v36 = vpop.f32.mrb[7].mxu0  ;;  %v691_v37 = vpop.f32.mrb[7].mxu1  ;;  %v273_v41 = vmul.f32 %v685_v34, %v685_v34  ;;  %v281_v47 = vmul.f32 %v687_v35, %v687_v35 }
 0x126   :  { %v271_v42 = vmul.f32 %v689_v36, %v689_v36  ;;  %v279_v44 = vmul.f32 %v691_v37, %v691_v37 }
 0x129   :  { %300 = vadd.xlane.f32.xlu1 %v275_v38  ;;  %284 = vadd.xlane.f32.xlu0 %v267_v39 }
 0x12d   :  { %294 = vadd.xlane.f32.xlu0 %v272_v40  ;;  %296 = vadd.xlane.f32.xlu1 %v273_v41 }
 0x131   :  { %290 = vadd.xlane.f32.xlu0 %v270_v43  ;;  %292 = vadd.xlane.f32.xlu1 %v271_v42 }
 0x135   :  { %306 = vadd.xlane.f32.xlu0 %v278_v45  ;;  %308 = vadd.xlane.f32.xlu1 %v279_v44 }
 0x139   :  { %310 = vadd.xlane.f32.xlu0 %v280_v46  ;;  %312 = vadd.xlane.f32.xlu1 %v281_v47 }
 0x1aa   :  { %v303_v48 = vpop.xlane.xlu0 %302  ;;  %v287_v49 = vpop.xlane.xlu1 %286 }
 0x1ab   :  { %v324_v50 = vadd.f32 1e-06, %v303_v48  ;;  %v316_v51 = vadd.f32 1e-06, %v287_v49 }
 0x1ad   :  { %499 = vrsqrt.f32 %v324_v50 }
 0x1ae   :  { %501 = vrsqrt.f32 %v316_v51  ;;  %v283_v52 = vpop.xlane.xlu0 %282  ;;  %v289_v53 = vpop.xlane.xlu1 %288 }
 0x1af   :  { %v314_v54 = vadd.f32 1e-06, %v283_v52  ;;  %v317_v55 = vadd.f32 1e-06, %v289_v53 }
 0x1b1   :  { %503 = vrsqrt.f32 %v314_v54 }
 0x1b2   :  { %505 = vrsqrt.f32 %v317_v55  ;;  %v299_v56 = vpop.xlane.xlu0 %298  ;;  %v305_v57 = vpop.xlane.xlu1 %304 }
 0x1b3   :  { %v322_v58 = vadd.f32 1e-06, %v299_v56  ;;  %v325_v59 = vadd.f32 1e-06, %v305_v57 }
 0x1b5   :  { %507 = vrsqrt.f32 %v322_v58 }
 0x1b6   :  { %509 = vrsqrt.f32 %v325_v59  ;;  %v301_v60 = vpop.xlane.xlu1 %300  ;;  %v285_v61 = vpop.xlane.xlu0 %284 }
 0x1b7   :  { %v500_v62 = vpop.eup %499  ;;  %v323_v63 = vadd.f32 1e-06, %v301_v60  ;;  %v315_v0 = vadd.f32 1e-06, %v285_v61 }
 0x1b8   :  { %v502_v1 = vpop.eup %501  ;;  %v356_v2 = vmul.f32 %v500_v62, %v651_v17 }
 0x1b9   :  { %v348_v3 = vmul.f32 %v502_v1, %v649_v16  ;;  %511 = vrsqrt.f32 %v323_v63 }
 0x1ba   :  { %372 = vst [vmem:[#allocation7 + $0x50] sm:$0xff] %v356_v2  ;;  %513 = vrsqrt.f32 %v315_v0  ;;  %v295_v4 = vpop.xlane.xlu0 %294  ;;  %v297_v5 = vpop.xlane.xlu1 %296 }
 0x1bb   :  { %v504_v6 = vpop.eup %503  ;;  %364 = vst [vmem:[#allocation7 + $0x10] sm:$0xff] %v348_v3  ;;  %v320_v7 = vadd.f32 1e-06, %v295_v4  ;;  %v321_v8 = vadd.f32 1e-06, %v297_v5 }
 0x1bc   :  { %v506_v9 = vpop.eup %505  ;;  %v346_v10 = vmul.f32 %v504_v6, %v653_v18 }
 0x1bd   :  { %v349_v11 = vmul.f32 %v506_v9, %v661_v22  ;;  %515 = vrsqrt.f32 %v320_v7 }
 0x1be   :  { %362 = vst [vmem:[#allocation7] sm:$0xff] %v346_v10  ;;  %517 = vrsqrt.f32 %v321_v8  ;;  %v291_v12 = vpop.xlane.xlu0 %290  ;;  %v293_v13 = vpop.xlane.xlu1 %292 }
 0x1bf   :  { %v508_v14 = vpop.eup %507  ;;  %365 = vst [vmem:[#allocation7 + $0x18] sm:$0xff] %v349_v11  ;;  %v318_v15 = vadd.f32 1e-06, %v291_v12  ;;  %v319_v16 = vadd.f32 1e-06, %v293_v13 }
 0x1c0   :  { %v510_v17 = vpop.eup %509  ;;  %v354_v20 = vmul.f32 %v508_v14, %v655_v19 }
 0x1c1   :  { %v357_v21 = vmul.f32 %v510_v17, %v663_v23  ;;  %519 = vrsqrt.f32 %v318_v15 }
 0x1c2   :  { %370 = vst [vmem:[#allocation7 + $0x40] sm:$0xff] %v354_v20  ;;  %521 = vrsqrt.f32 %v319_v16  ;;  %v307_v18 = vpop.xlane.xlu0 %306  ;;  %v309_v26 = vpop.xlane.xlu1 %308 }
 0x1c3   :  { %v512_v22 = vpop.eup %511  ;;  %373 = vst [vmem:[#allocation7 + $0x58] sm:$0xff] %v357_v21  ;;  %v326_v27 = vadd.f32 1e-06, %v307_v18  ;;  %v327_v30 = vadd.f32 1e-06, %v309_v26 }
 0x1c4   :  { %v514_v31 = vpop.eup %513  ;;  %v355_v38 = vmul.f32 %v512_v22, %v665_v24 }
 0x1c5   :  { %v347_v39 = vmul.f32 %v514_v31, %v667_v25  ;;  %523 = vrsqrt.f32 %v326_v27 }
 0x1c6   :  { %371 = vst [vmem:[#allocation7 + $0x48] sm:$0xff] %v355_v38  ;;  %525 = vrsqrt.f32 %v327_v30  ;;  %v311_v19 = vpop.xlane.xlu0 %310  ;;  %v313_v40 = vpop.xlane.xlu1 %312 }
 0x1c7   :  { %v516_v23 = vpop.eup %515  ;;  %363 = vst [vmem:[#allocation7 + $0x8] sm:$0xff] %v347_v39  ;;  %v328_v41 = vadd.f32 1e-06, %v311_v19  ;;  %v329_v42 = vadd.f32 1e-06, %v313_v40 }
 0x1c8   :  { %v518_v43 = vpop.eup %517  ;;  %v352_v44 = vmul.f32 %v516_v23, %v673_v28 }
 0x1c9   :  { %v353_v45 = vmul.f32 %v518_v43, %v685_v34  ;;  %527 = vrsqrt.f32 %v328_v41 }
 0x1ca   :  { %368 = vst [vmem:[#allocation7 + $0x30] sm:$0xff] %v352_v44  ;;  %529 = vrsqrt.f32 %v329_v42 }
 0x1cb   :  { %v520_v24 = vpop.eup %519  ;;  %369 = vst [vmem:[#allocation7 + $0x38] sm:$0xff] %v353_v45 }
 0x1cc   :  { %v522_v25 = vpop.eup %521  ;;  %v350_v46 = vmul.f32 %v520_v24, %v681_v32 }
 0x1cd   :  { %v351_v47 = vmul.f32 %v522_v25, %v689_v36 }
 0x1ce   :  { %366 = vst [vmem:[#allocation7 + $0x20] sm:$0xff] %v350_v46 }
 0x1cf   :  { %v524_v48 = vpop.eup %523  ;;  %367 = vst [vmem:[#allocation7 + $0x28] sm:$0xff] %v351_v47 }
 0x1d0   :  { %v526_v49 = vpop.eup %525  ;;  %v358_v50 = vmul.f32 %v524_v48, %v683_v33 }
 0x1d1   :  { %v359_v28 = vmul.f32 %v526_v49, %v691_v37 }
 0x1d2   :  { %374 = vst [vmem:[#allocation7 + $0x60] sm:$0xff] %v358_v50 }
 0x1d3   :  { %v528_v34 = vpop.eup %527  ;;  %375 = vst [vmem:[#allocation7 + $0x68] sm:$0xff] %v359_v28 }
 0x1d4   :  { %v530_v51 = vpop.eup %529  ;;  %v360_v52 = vmul.f32 %v528_v34, %v675_v29 }
 0x1d5   :  { %v361_v32 = vmul.f32 %v530_v51, %v687_v35 }
 0x1d6   :  { %376 = vst [vmem:[#allocation7 + $0x70] sm:$0xff] %v360_v52 }
 0x1d7   :  { %377 = vst [vmem:[#allocation7 + $0x78] sm:$0xff] %v361_v32 }
 0x1d8   :  { %586 = shalt.err (!%p583_p6)
}
 0x1d9   :  { %s587_s10 = scalar_lea.hbm %s743_s2, 2048 }
 0x1da   :  { %p588_p7 = scmp.ne.s32.totalorder %s743_s2, %s587_s10  ;;  %p591_p8 = scmp.lt.u32.totalorder %s587_s10, %s743_s2 }
 0x1dc   :  { %p593_p9 = pnand %p591_p8, %p588_p7 }
 0x1de   :  { %596 = shalt.err (!%p593_p9)
}
 0x1df   :  { %s608_s15 = smov 128   ;;  %s609_s16 = smov 8  }
 0x1e0   :  { %389 = dma.vmem_to_hbm [thread:$0]  %s384_s6, 2048, %s743_s2, [#allocation4], %s608_s15, %s608_s15, %s609_s16  }
 0x1e1   :  { %601 = dma.done.wait [#allocation4], 2048  }
 0x1e2   :  { %602 = vsyncadd [#allocation4], 4294965248 }
 0x1e3   :  { %393 = vsyncpa [#allocation3], 1 }
 0x1e4   :  { %394 = vsyncpa [#allocation6], 1 }
 0x1e5   :  { %395 = vsyncpa [#allocation4], 1 }

</bundles_post_ra>
